<compile_context>
chip_gen: v6e
topology: v6e:2x2x1
jax: 0.10.0
libtpu: 0.0.40
codegen_flags: <defaults>
</compile_context>

<pallas_src>
import jax
import jax.numpy as jnp
from jax.experimental import pallas as pl
from jax.experimental.pallas import tpu as pltpu

NEG_SLOPE = 0.01  # PyTorch F.leaky_relu default


def head_mlp_kernel(x_ref, w1_ref, p_ref, o_ref):
    # x_ref : (TILE_N, 50) input rows (BN already folded into w1/b1)
    # w1_ref: (50, 10)     fc1 weight with BN scale folded in
    # p_ref : (3, 10)      row0 = folded fc1 bias, row1 = fc2 weight row,
    #                      row2 = fc2 bias (broadcast)
    x = x_ref[...]
    p = p_ref[...]
    b1 = p[0:1, :]                                   # (1, 10)
    w2 = p[1:2, :]                                   # (1, 10)
    b2 = p[2:3, 0:1]                                 # (1, 1)

    # fc1 on the MXU (the only matmul worth an MXU pass here).
    h = jnp.dot(x, w1_ref[...], preferred_element_type=jnp.float32) + b1
    # LeakyReLU (VPU).
    h = jnp.where(h > 0, h, NEG_SLOPE * h)
    # fc2 as VPU mul + lane reduction instead of a 1-wide MXU matmul.
    o_ref[...] = jnp.sum(h * w2, axis=-1, keepdims=True) + b2


def _round_up(a, b):
    return ((a + b - 1) // b) * b


def head_mlp(x, bn_gamma, bn_beta, bn_mean, bn_var, w1, b1, w2, b2,
             eps=1e-5, tile_n=512):
    """x: (N, 50) f32. w1: (50, 10), b1: (10,), w2: (10, 1), b2: (1,)."""
    n, f_in = x.shape
    f_hid = w1.shape[1]

    # --- plain-JAX glue: fold eval-mode BatchNorm into fc1 -------------------
    scale = bn_gamma / jnp.sqrt(bn_var + eps)            # (50,)
    shift = bn_beta - bn_mean * scale                    # (50,)
    w1f = (w1 * scale[:, None]).astype(jnp.float32)      # (50, 10)
    b1f = shift @ w1 + b1                                # (10,)
    # Pack the tiny params into a single operand (one DMA instead of three).
    params = jnp.stack(
        [b1f, w2.reshape(-1), jnp.broadcast_to(b2, (f_hid,))], axis=0
    ).astype(jnp.float32)                                # (3, 10)

    # --- batch tiling --------------------------------------------------------
    tile = min(tile_n, _round_up(n, 8))                  # multiple of 8 sublanes
    n_pad = _round_up(n, tile)
    if n_pad != n:
        x = jnp.pad(x, ((0, n_pad - n), (0, 0)))
    grid = (n_pad // tile,)

    out = pl.pallas_call(
        head_mlp_kernel,
        out_shape=jax.ShapeDtypeStruct((n_pad, 1), jnp.float32),
        grid=grid,
        in_specs=[
            pl.BlockSpec((tile, f_in), lambda i: (i, 0)),    # x rows (tiled)
            pl.BlockSpec((f_in, f_hid), lambda i: (0, 0)),   # resident weights
            pl.BlockSpec((3, f_hid), lambda i: (0, 0)),      # packed params
        ],
        out_specs=pl.BlockSpec((tile, 1), lambda i: (i, 0)),
        compiler_params=pltpu.CompilerParams(
            dimension_semantics=("parallel",)),
    )(x, w1f, params)
    return out[:n]


def _ref(x, bn_gamma, bn_beta, bn_mean, bn_var, w1, b1, w2, b2, eps=1e-5):
    xn = (x - bn_mean) / jnp.sqrt(bn_var + eps) * bn_gamma + bn_beta
    h = xn @ w1 + b1
    h = jnp.where(h > 0, h, NEG_SLOPE * h)
    return h @ w2 + b2


if __name__ == "__main__":
    key = jax.random.PRNGKey(0)
    kx, kw1, kb1, kw2, kb2, kg, kbt = jax.random.split(key, 7)

    N, F_IN, F_HID, F_OUT = 8, 50, 10, 1

    x = jax.random.normal(kx, (N, F_IN), dtype=jnp.float32)

    # Deterministic synthetic parameters (shapes per HeadMLP.__init__).
    w1 = jax.random.normal(kw1, (F_IN, F_HID), dtype=jnp.float32) * 0.1   # fc1.weight.T
    b1 = jax.random.normal(kb1, (F_HID,), dtype=jnp.float32) * 0.1        # fc1.bias
    w2 = jax.random.normal(kw2, (F_HID, F_OUT), dtype=jnp.float32) * 0.1  # fc2.weight.T
    b2 = jax.random.normal(kb2, (F_OUT,), dtype=jnp.float32) * 0.1        # fc2.bias

    bn_gamma = 1.0 + 0.1 * jax.random.normal(kg, (F_IN,), dtype=jnp.float32)
    bn_beta = 0.1 * jax.random.normal(kbt, (F_IN,), dtype=jnp.float32)
    bn_mean = jnp.zeros((F_IN,), dtype=jnp.float32)   # running_mean
    bn_var = jnp.ones((F_IN,), dtype=jnp.float32)     # running_var

    # Single-tile path (N = 8).
    out = head_mlp(x, bn_gamma, bn_beta, bn_mean, bn_var, w1, b1, w2, b2)
    out = jax.block_until_ready(out)
    ref = _ref(x, bn_gamma, bn_beta, bn_mean, bn_var, w1, b1, w2, b2)
    assert out.shape == (N, 1), out.shape
    assert jnp.allclose(out, ref, atol=1e-5, rtol=1e-5), (out, ref)

    # Gridded path (N = 20 -> padded to 24, 3 grid steps of 8 rows) to
    # exercise the batched/tiled code path and the padding slice-off.
    N2 = 20
    x2 = jax.random.normal(jax.random.PRNGKey(1), (N2, F_IN), dtype=jnp.float32)
    out2 = head_mlp(x2, bn_gamma, bn_beta, bn_mean, bn_var, w1, b1, w2, b2,
                    tile_n=8)
    out2 = jax.block_until_ready(out2)
    ref2 = _ref(x2, bn_gamma, bn_beta, bn_mean, bn_var, w1, b1, w2, b2)
    assert out2.shape == (N2, 1), out2.shape
    assert jnp.allclose(out2, ref2, atol=1e-5, rtol=1e-5), (out2, ref2)

    print("KERNEL_OK")
</pallas_src>

<mosaic_0001>
module attributes {stable_mosaic.version = 11 : i64} {
  func.func @head_mlp_kernel(%arg0: i32, %arg1: memref<8x50xf32, #tpu.memory_space<vmem>>, %arg2: memref<50x10xf32, #tpu.memory_space<vmem>>, %arg3: memref<3x10xf32, #tpu.memory_space<vmem>>, %arg4: memref<8x1xf32, #tpu.memory_space<vmem>>) attributes {dimension_semantics = [#tpu.dimension_semantics<parallel>], iteration_bounds = array<i64: 1>, scalar_prefetch = 0 : i64, scratch_operands = 0 : i64, tpu.core_type = #tpu.core_type<tc>, window_params = [{transform_indices = @transform_0, window_bounds = array<i64: 8, 50>}, {pipeline_mode = #tpu.pipeline_mode<synchronous>, transform_indices = @transform_1, window_bounds = array<i64: 50, 10>}, {pipeline_mode = #tpu.pipeline_mode<synchronous>, transform_indices = @transform_2, window_bounds = array<i64: 3, 10>}, {transform_indices = @transform_3, window_bounds = array<i64: 8, 1>}]} {
    %c0 = arith.constant 0 : index
    %c0_0 = arith.constant 0 : index
    %0 = vector.load %arg1[%c0, %c0_0] : memref<8x50xf32, #tpu.memory_space<vmem>>, vector<8x50xf32>
    %c0_1 = arith.constant 0 : index
    %c0_2 = arith.constant 0 : index
    %1 = vector.load %arg3[%c0_1, %c0_2] : memref<3x10xf32, #tpu.memory_space<vmem>>, vector<3x10xf32>
    %2 = vector.extract_strided_slice %1 {offsets = [0, 0], sizes = [1, 10], strides = [1, 1]} : vector<3x10xf32> to vector<1x10xf32>
    %3 = vector.extract_strided_slice %1 {offsets = [1, 0], sizes = [1, 10], strides = [1, 1]} : vector<3x10xf32> to vector<1x10xf32>
    %4 = vector.extract_strided_slice %1 {offsets = [2, 0], sizes = [1, 1], strides = [1, 1]} : vector<3x10xf32> to vector<1x1xf32>
    %c0_3 = arith.constant 0 : index
    %c0_4 = arith.constant 0 : index
    %5 = vector.load %arg2[%c0_3, %c0_4] : memref<50x10xf32, #tpu.memory_space<vmem>>, vector<50x10xf32>
    %cst = arith.constant dense<0.000000e+00> : vector<8x10xf32>
    %6 = tpu.matmul %0, %5, %cst {dimension_numbers = #tpu.dot_dimension_numbers<[1], [0], [0], [1], [0, 0, 1, 1], [], []>} : vector<8x50xf32>, vector<50x10xf32>, vector<8x10xf32> -> vector<8x10xf32>
    %7 = vector.broadcast %2 : vector<1x10xf32> to vector<8x10xf32>
    %8 = arith.addf %6, %7 : vector<8x10xf32>
    %cst_5 = arith.constant 0.000000e+00 : f32
    %9 = vector.broadcast %cst_5 : f32 to vector<8x10xf32>
    %10 = arith.cmpf ogt, %8, %9 : vector<8x10xf32>
    %cst_6 = arith.constant 0.00999999977 : f32
    %11 = vector.broadcast %cst_6 : f32 to vector<8x10xf32>
    %12 = arith.mulf %11, %8 : vector<8x10xf32>
    %13 = arith.select %10, %8, %12 : vector<8x10xi1>, vector<8x10xf32>
    %14 = vector.broadcast %3 : vector<1x10xf32> to vector<8x10xf32>
    %15 = arith.mulf %13, %14 : vector<8x10xf32>
    %cst_7 = arith.constant dense<0.000000e+00> : vector<8xf32>
    %16 = vector.multi_reduction <add>, %15, %cst_7 [1] : vector<8x10xf32> to vector<8xf32>
    %17 = vector.shape_cast %16 : vector<8xf32> to vector<8x1xf32>
    %18 = vector.broadcast %4 : vector<1x1xf32> to vector<8x1xf32>
    %19 = arith.addf %17, %18 : vector<8x1xf32>
    %c0_8 = arith.constant 0 : index
    %c0_9 = arith.constant 0 : index
    %20 = vector.load %arg4[%c0_8, %c0_9] : memref<8x1xf32, #tpu.memory_space<vmem>>, vector<8x1xf32>
    tpu.vector_store %arg4[%c0_8, %c0_9], %19 {strides = array<i32>} : memref<8x1xf32, #tpu.memory_space<vmem>>, vector<8x1xf32>,
    return
  }
  func.func @transform_0(%arg0: i32) -> (i32, i32) {
    %c0_i32 = arith.constant 0 : i32
    %c0_i32_0 = arith.constant 0 : i32
    return %arg0, %c0_i32 : i32, i32
  }
  func.func @transform_1(%arg0: i32) -> (i32, i32) {
    %c0_i32 = arith.constant 0 : i32
    %c0_i32_0 = arith.constant 0 : i32
    %c0_i32_1 = arith.constant 0 : i32
    return %c0_i32, %c0_i32_0 : i32, i32
  }
  func.func @transform_2(%arg0: i32) -> (i32, i32) {
    %c0_i32 = arith.constant 0 : i32
    %c0_i32_0 = arith.constant 0 : i32
    %c0_i32_1 = arith.constant 0 : i32
    return %c0_i32, %c0_i32_0 : i32, i32
  }
  func.func @transform_3(%arg0: i32) -> (i32, i32) {
    %c0_i32 = arith.constant 0 : i32
    %c0_i32_0 = arith.constant 0 : i32
    return %arg0, %c0_i32 : i32, i32
  }
}

</mosaic_0001>

<bundles_post_ra>
// kernel: tpu_custom_call.1
= control target key start
LH: loop header
LB: loop body
LE: loop exit
PB: predicated region body
PF: predicated region fallthrough
CT: control target
= control target key end

     0   :  { %vm31_vm0 = vcmask 1041408   ;;  %v157_v0 = vmov 0.0   ;;  %vm158_vm1 = vmmov 0   ;;  %vm27_vm2 = vcmask 408576   ;;  %s209_s1 = inlined_call_operand.vmem [shape: f32[50,10], index: 1, kind: input, shape index: {}]   ;;  %s210_s0 = inlined_call_operand.vmem [shape: f32[8,50], index: 0, kind: input, shape index: {}]   ;;  %s211_s2 = inlined_call_operand.vmem [shape: f32[3,10], index: 2, kind: input, shape index: {}]   ;;  %s212_s3 = inlined_call_operand.vmem [shape: f32[8,1], index: 3, kind: output, shape index: {}]  }
   0x1   :  { %138 = vmatprep.subr.mxu0 %v157_v0  ;;  %v22_v1 = vld [vmem:[%s209_s1 + $0x30] sm:$0x3]  ;;  %v21_v2 = vld [vmem:[%s209_s1 + $0x28] sm:$0xff]  ;;  %152 = vmatprep.mubr.msk.f32.mxu0 %vm158_vm1, %v157_v0  ;;  %v20_v3 = vld [vmem:[%s209_s1 + $0x20] sm:$0xff]  ;;  %v23_v9 = vlaneseq  ;;  %vm113_vm4 = vcmask 80896   ;;  %vm122_vm5 = vcmask 7168  }
   0x2   :  { %139 = vmatpush3.msk.msra.mxu0 %vm31_vm0, %v22_v1  ;;  %v19_v4 = vld [vmem:[%s209_s1 + $0x18] sm:$0xff]  ;;  %v18_v5 = vld [vmem:[%s209_s1 + $0x10] sm:$0xff]  ;;  %v17_v6 = vld [vmem:[%s209_s1 + $0x8] sm:$0xff] }
   0x3   :  { %140 = vmatprep.subr.mxu0 %v157_v0  ;;  %v16_v7 = vld [vmem:[%s209_s1] sm:$0xff]  ;;  %v24_v10 = vshrl.u32 %v23_v9, 7 }
   0x4   :  { %141 = vmatpush3.msra.mxu0 %v21_v2  ;;  %v14_v8 = vld [vmem:[%s210_s0] sm:$0xff] }
   0x5   :  { %142 = vmatprep.subr.mxu0 %v157_v0  ;;  %v25_v11 = vsub.s32 0, %v24_v10  ;;  %v15_v12 = vld [vmem:[%s211_s2] sm:$0x7]  ;;  %v110_v14 = vsub.s32 1, %v24_v10  ;;  %v119_v23 = vsub.s32 2, %v24_v10 }
   0x6   :  { %143 = vmatpush3.msra.mxu0 %v20_v3 }
   0x7   :  { %144 = vmatprep.subr.mxu0 %v157_v0  ;;  %v26_v13 = vrot.slane %v15_v12, %v25_v11  ;;  %v111_v18 = vrot.slane %v15_v12, %v110_v14  ;;  %v120_v24 = vrot.slane %v15_v12, %v119_v23 }
   0x8   :  { %145 = vmatpush3.msra.mxu0 %v19_v4 }
   0x9   :  { %146 = vmatprep.subr.mxu0 %v157_v0 }
   0xa   :  { %147 = vmatpush3.msra.mxu0 %v18_v5 }
   0xb   :  { %148 = vmatprep.subr.mxu0 %v157_v0 }
   0xc   :  { %149 = vmatpush3.msra.mxu0 %v17_v6 }
   0xd   :  { %150 = vmatprep.subr.mxu0 %v157_v0 }
   0xe   :  { %151 = vmatpush3.msra.mxu0 %v16_v7 }
   0xf   :  { %153 = vmatmul.mubr.msk.f32.vlgmr.msra.gmra.mxu0 %vm27_vm2, %v14_v8 }
  0xcf   :  { %v101_v15 = vpop.f32.mrf.mxu0 }
  0xd0   :  { %v102_v16 = vadd.f32 %v101_v15, %v26_v13 }
  0xd1   :  { %v154_v17 = vpop.f32.mrf.mxu0 }
  0xd2   :  { %v106_v19 = vmul.f32 0.01, %v102_v16  ;;  %vm105_vm3 = vcmp.gt.f32.partialorder %v102_v16, 0.0 }
  0xd4   :  { %v107_v20 = vsel %vm105_vm3, %v102_v16, %v106_v19 }
  0xd5   :  { %v112_v21 = vmul.f32 %v111_v18, %v107_v20 }
  0xd7   :  { %v114_v22 = vsel %vm113_vm4, %v112_v21, 0.0 }
  0xd8   :  { %115 = vadd.xlane.f32.xlu0 %v114_v22 }
 0x161   :  { %v116_v25 = vpop.xlane.xlu0 %115 }
 0x162   :  { %v121_v26 = vadd.f32 %v120_v24, %v116_v25 }
 0x164   :  { %123 = vst.msk [vmem:[%s212_s3] sm:$0xff] %vm122_vm5, %v121_v26 }

</bundles_post_ra>
